<compile_context>
chip_gen: v6e
topology: v6e:2x2x1
jax: 0.10.0
libtpu: 0.0.40
codegen_flags: <defaults>
</compile_context>

<pallas_src>
import math
from functools import partial

import jax
import jax.numpy as jnp
from jax.experimental import pallas as pl
from jax.experimental.pallas import tpu as pltpu

# ----------------------------- small config --------------------------------
PATCH = 8          # patch size (real model: 16)
IN_CH = 4          # input channels (real model: 3)
EMBED = 128        # embed_dim (real model: 768)
HEADS = 4
HEAD_DIM = EMBED // HEADS
DEPTH = 2          # number of transformer blocks (real model: 12)
MLP_HIDDEN = 4 * EMBED
Z_IMG = 16         # template image size -> 2x2 = 4 patches
X_IMG = 32         # search image size   -> 4x4 = 16 patches
NZ = (Z_IMG // PATCH) ** 2
NX = (X_IMG // PATCH) ** 2
L_REAL = 1 + NZ + NX          # 21 real tokens (cls + z + x)
L_PAD = 24                    # padded sequence length (multiple of 8)
LN_EPS = 1e-6
NEG_INF = -1e30

# bf16 at the MXU inputs (v6e/v7x peak); f32 accumulation + f32 VPU math.
MATMUL_DTYPE = jnp.bfloat16


# ----------------------------- shared math ----------------------------------
def _layernorm_rows(v, g, b):
    mu = jnp.mean(v, axis=-1, keepdims=True)
    var = jnp.mean((v - mu) ** 2, axis=-1, keepdims=True)
    return (v - mu) * jax.lax.rsqrt(var + LN_EPS) * g + b


def _gelu_exact(x):
    return 0.5 * x * (1.0 + jax.lax.erf(x * jnp.float32(1.0 / math.sqrt(2.0))))


# ----------------------------- Pallas kernels -------------------------------
def _patch_embed_kernel(p_ref, w_ref, b_ref, o_ref):
    # p_ref: (1, R, K) bf16 patches; w_ref: (1, K, D) bf16; b_ref: (1, 1, D) f32
    o_ref[0] = (jnp.dot(p_ref[0], w_ref[0], preferred_element_type=jnp.float32)
                + b_ref[0])


def _encoder_kernel(tok_ref, pos_ref,
                    ln1g_ref, ln1b_ref, wqkv_ref, bqkv_ref,
                    wproj_ref, bproj_ref, ln2g_ref, ln2b_ref,
                    w1_ref, b1_ref, w2_ref, b2_ref,
                    fing_ref, finb_ref,
                    o_ref, acc_ref, *, batch):
    """One depth step of the fused ViT encoder.

    grid = (DEPTH,).  Both streams are folded into the row dimension
    (rows = 2*batch*L_PAD); the activation lives in acc_ref (VMEM) across
    the depth axis while per-block weights are streamed (double-buffered)
    via depth-indexed BlockSpecs.  The per-stream final LayerNorm is applied
    at the last depth step to the two static row halves.
    """
    d = pl.program_id(0)
    nbatch = 2 * batch
    rows = nbatch * L_PAD

    @pl.when(d == 0)
    def _():
        # fused glue: raw token slab + (pos_embed / cls_token) additive slab
        acc_ref[...] = tok_ref[...] + pos_ref[...]

    x = acc_ref[...]                                    # (rows, D) f32

    # additive key mask built in-kernel: 0 for real tokens, -1e30 for padding
    key_ids = jax.lax.broadcasted_iota(jnp.int32, (1, 1, L_PAD), 2)
    key_mask = jnp.where(key_ids < L_REAL, jnp.float32(0.0),
                         jnp.float32(NEG_INF))

    # ------------------------- attention branch -----------------------------
    h = _layernorm_rows(x, ln1g_ref[0], ln1b_ref[0])
    qkv = (jnp.dot(h.astype(MATMUL_DTYPE), wqkv_ref[0],
                   preferred_element_type=jnp.float32) + bqkv_ref[0])

    q3 = qkv[:, 0:EMBED].reshape(nbatch, L_PAD, EMBED)
    k3 = qkv[:, EMBED:2 * EMBED].reshape(nbatch, L_PAD, EMBED)
    v3 = qkv[:, 2 * EMBED:3 * EMBED].reshape(nbatch, L_PAD, EMBED)

    scale = jnp.float32(1.0 / math.sqrt(HEAD_DIM))
    head_outs = []
    for hh in range(HEADS):
        sl = slice(hh * HEAD_DIM, (hh + 1) * HEAD_DIM)
        qh = q3[:, :, sl].astype(MATMUL_DTYPE)
        kh = k3[:, :, sl].astype(MATMUL_DTYPE)
        vh = v3[:, :, sl].astype(MATMUL_DTYPE)
        # single leading batch dim -> known-good Mosaic batched matmul form
        s = jnp.einsum('bld,bmd->blm', qh, kh,
                       preferred_element_type=jnp.float32) * scale
        s = s + key_mask                                # mask padded keys
        m = jnp.max(s, axis=-1, keepdims=True)
        p = jnp.exp(s - m)
        denom = jnp.sum(p, axis=-1, keepdims=True)
        p = p * pl.reciprocal(denom, approx=True)       # EUP vrcp slot
        oh = jnp.einsum('blm,bmd->bld', p.astype(MATMUL_DTYPE), vh,
                        preferred_element_type=jnp.float32)
        head_outs.append(oh.reshape(rows, HEAD_DIM))

    # one lane-dense (rows, EMBED) value fed straight to the proj matmul
    attn = jnp.concatenate(head_outs, axis=-1)
    attn = (jnp.dot(attn.astype(MATMUL_DTYPE), wproj_ref[0],
                    preferred_element_type=jnp.float32) + bproj_ref[0])
    x = x + attn

    # ----------------------------- MLP branch --------------------------------
    h2 = _layernorm_rows(x, ln2g_ref[0], ln2b_ref[0])
    h2 = (jnp.dot(h2.astype(MATMUL_DTYPE), w1_ref[0],
                  preferred_element_type=jnp.float32) + b1_ref[0])
    h2 = _gelu_exact(h2)
    h2 = (jnp.dot(h2.astype(MATMUL_DTYPE), w2_ref[0],
                  preferred_element_type=jnp.float32) + b2_ref[0])
    x = x + h2

    acc_ref[...] = x

    @pl.when(d == DEPTH - 1)
    def _():
        # per-stream final LayerNorm: color rows first half, ir rows second
        mu = jnp.mean(x, axis=-1, keepdims=True)
        var = jnp.mean((x - mu) ** 2, axis=-1, keepdims=True)
        normed = (x - mu) * jax.lax.rsqrt(var + LN_EPS)
        half = rows // 2
        o_ref[:half, :] = normed[:half] * fing_ref[0] + finb_ref[0]
        o_ref[half:, :] = normed[half:] * fing_ref[1] + finb_ref[1]


# ----------------------------- wrappers -------------------------------------
def patch_embed_all(imgs, weights, biases):
    """All four Conv2d(kernel=stride=PATCH) patch embeds in ONE pallas_call.

    imgs: list of NCHW images, weights: list of (EMBED, C, P, P),
    biases: list of (EMBED,).  Returns a list of (B, n_patches, EMBED).
    """
    n = len(imgs)
    K = IN_CH * PATCH * PATCH
    slabs, counts = [], []
    for img in imgs:
        B, C, H, W = img.shape
        hp, wp = H // PATCH, W // PATCH
        p = img.reshape(B, C, hp, PATCH, wp, PATCH).transpose(0, 2, 4, 1, 3, 5)
        p = p.reshape(B * hp * wp, K)
        counts.append((B, hp * wp))
        slabs.append(p)
    rmax = max(s.shape[0] for s in slabs)
    rmax = ((rmax + 15) // 16) * 16                       # bf16 sublane tile
    slabs = [jnp.pad(s, ((0, rmax - s.shape[0]), (0, 0))) for s in slabs]
    # pre-cast to bf16 on the host: only ever consumed as a bf16 MXU operand
    patches = jnp.stack(slabs).astype(MATMUL_DTYPE)       # (n, rmax, K) bf16
    w_mat = jnp.stack([w.reshape(EMBED, K).T for w in weights]
                      ).astype(MATMUL_DTYPE)              # (n, K, D) bf16
    b_mat = jnp.stack([b.reshape(1, EMBED) for b in biases]
                      ).astype(jnp.float32)               # (n, 1, D) f32

    out = pl.pallas_call(
        _patch_embed_kernel,
        grid=(n,),
        out_shape=jax.ShapeDtypeStruct((n, rmax, EMBED), jnp.float32),
        in_specs=[
            pl.BlockSpec((1, rmax, K), lambda i: (i, 0, 0)),
            pl.BlockSpec((1, K, EMBED), lambda i: (i, 0, 0)),
            pl.BlockSpec((1, 1, EMBED), lambda i: (i, 0, 0)),
        ],
        out_specs=pl.BlockSpec((1, rmax, EMBED), lambda i: (i, 0, 0)),
        compiler_params=pltpu.CompilerParams(dimension_semantics=("parallel",)),
    )(patches, w_mat, b_mat)

    results = []
    for i, (B, npatch) in enumerate(counts):
        results.append(out[i, :B * npatch].reshape(B, npatch, EMBED))
    return results


def fused_encoder(z_c, x_c, z_i, x_i, params):
    """Both streams (folded into rows) through DEPTH blocks + final LN in one
    pallas_call.  Inputs are raw patch-embed outputs; pos-embed / cls-token
    additions happen inside the kernel's d==0 prologue."""
    B = x_c.shape[0]
    rows = 2 * B * L_PAD

    # raw token slab: [zero cls row | z patches | x patches | zero pad rows]
    def build_tok(z, x):
        zeros1 = jnp.zeros((B, 1, EMBED), jnp.float32)
        pad = jnp.zeros((B, L_PAD - L_REAL, EMBED), jnp.float32)
        return jnp.concatenate([zeros1, z, x, pad], axis=1)      # (B, L_PAD, D)

    tok = jnp.stack([build_tok(z_c, x_c), build_tok(z_i, x_i)]
                    ).reshape(rows, EMBED)

    # additive pos/cls slab (per stream, broadcast over batch)
    def build_pos(cls_tok, pos, zpos):
        cls_row = (cls_tok + pos[:, :1, :]).reshape(1, EMBED)
        z_rows = zpos.reshape(NZ, EMBED)
        x_rows = pos[:, 1:, :].reshape(NX, EMBED)
        pad = jnp.zeros((L_PAD - L_REAL, EMBED), jnp.float32)
        return jnp.concatenate([cls_row, z_rows, x_rows, pad], axis=0)

    pos_c = build_pos(params['cls_token'], params['pos_embed'],
                      params['z_pos_embed'])
    pos_i = build_pos(params['cls_token_p'], params['pos_embed_p'],
                      params['z_pos_embed_p'])
    posadd = jnp.stack([pos_c, pos_i])                    # (2, L_PAD, D)
    posadd = jnp.broadcast_to(posadd[:, None], (2, B, L_PAD, EMBED)
                              ).reshape(rows, EMBED)

    blocks = params['blocks']
    ln1g = jnp.stack([b['ln1_g'] for b in blocks]).reshape(DEPTH, 1, EMBED)
    ln1b = jnp.stack([b['ln1_b'] for b in blocks]).reshape(DEPTH, 1, EMBED)
    wqkv = jnp.stack([b['wqkv'] for b in blocks]).astype(MATMUL_DTYPE)
    bqkv = jnp.stack([b['bqkv'] for b in blocks]).reshape(DEPTH, 1, 3 * EMBED)
    wproj = jnp.stack([b['wproj'] for b in blocks]).astype(MATMUL_DTYPE)
    bproj = jnp.stack([b['bproj'] for b in blocks]).reshape(DEPTH, 1, EMBED)
    ln2g = jnp.stack([b['ln2_g'] for b in blocks]).reshape(DEPTH, 1, EMBED)
    ln2b = jnp.stack([b['ln2_b'] for b in blocks]).reshape(DEPTH, 1, EMBED)
    w1 = jnp.stack([b['w1'] for b in blocks]).astype(MATMUL_DTYPE)
    b1 = jnp.stack([b['b1'] for b in blocks]).reshape(DEPTH, 1, MLP_HIDDEN)
    w2 = jnp.stack([b['w2'] for b in blocks]).astype(MATMUL_DTYPE)
    b2 = jnp.stack([b['b2'] for b in blocks]).reshape(DEPTH, 1, EMBED)
    weight_args = [ln1g, ln1b, wqkv, bqkv, wproj, bproj,
                   ln2g, ln2b, w1, b1, w2, b2]

    # final LayerNorm differs per stream (norm for color, norm_p for ir)
    fin_g = jnp.stack([params['norm_g'], params['norm_p_g']]).reshape(2, 1, EMBED)
    fin_b = jnp.stack([params['norm_b'], params['norm_p_b']]).reshape(2, 1, EMBED)

    def depth_spec(arr):
        return pl.BlockSpec((1,) + arr.shape[1:], lambda d: (d, 0, 0))

    in_specs = [pl.BlockSpec((rows, EMBED), lambda d: (0, 0)),      # tok
                pl.BlockSpec((rows, EMBED), lambda d: (0, 0))]      # posadd
    in_specs += [depth_spec(a) for a in weight_args]
    in_specs += [pl.BlockSpec((2, 1, EMBED), lambda d: (0, 0, 0))] * 2

    # advisory cost estimate (total over the whole call)
    nbatch = 2 * B
    flops_step = (2 * rows * EMBED * 3 * EMBED                       # qkv
                  + 4 * nbatch * HEADS * L_PAD * L_PAD * HEAD_DIM    # scores+pv
                  + 2 * rows * EMBED * EMBED                         # proj
                  + 4 * rows * EMBED * MLP_HIDDEN)                   # mlp
    trans_step = nbatch * HEADS * L_PAD * L_PAD + rows * MLP_HIDDEN + 2 * rows
    weight_bytes = sum(int(a.size) * a.dtype.itemsize for a in weight_args)
    cost = pl.CostEstimate(
        flops=DEPTH * flops_step,
        transcendentals=DEPTH * trans_step,
        bytes_accessed=int(2 * rows * EMBED * 4      # tok + posadd
                           + rows * EMBED * 4        # output
                           + weight_bytes
                           + (fin_g.size + fin_b.size) * 4))

    # Explicit VMEM budget: double-buffered per-depth weights + resident
    # activations/IO + headroom, capped below v7x's 64 MiB/TC physical VMEM.
    step_weight_bytes = weight_bytes // DEPTH
    resident_bytes = int(tok.size + posadd.size + 2 * rows * EMBED
                         + fin_g.size + fin_b.size) * 4
    vmem_limit = int(min(48 * 1024 * 1024,
                         4 * step_weight_bytes + 4 * resident_bytes + (8 << 20)))

    out = pl.pallas_call(
        partial(_encoder_kernel, batch=B),
        grid=(DEPTH,),
        out_shape=jax.ShapeDtypeStruct((rows, EMBED), jnp.float32),
        in_specs=in_specs,
        out_specs=pl.BlockSpec((rows, EMBED), lambda d: (0, 0)),
        scratch_shapes=[pltpu.VMEM((rows, EMBED), jnp.float32)],   # activation
        compiler_params=pltpu.CompilerParams(
            dimension_semantics=("arbitrary",),
            vmem_limit_bytes=vmem_limit),
        cost_estimate=cost,
    )(tok, posadd, *weight_args, fin_g, fin_b)

    out = out.reshape(2, B, L_PAD, EMBED)
    return out[0], out[1]       # color stream, ir stream (padded rows intact)


def mae_encode_forward(params, z_color, z_ir, x1_color, x1_ir):
    """Mirrors MAEEncode.forward."""
    # interleave z/x slabs so a grid=(4,) "parallel" split balances v7x's 2 TCs
    z_c, x_c, z_i, x_i = patch_embed_all(
        [z_color, x1_color, z_ir, x1_ir],
        [params['z_patch_embed']['w'], params['patch_embed']['w'],
         params['z_patch_embed_p']['w'], params['patch_embed_p']['w']],
        [params['z_patch_embed']['b'], params['patch_embed']['b'],
         params['z_patch_embed_p']['b'], params['patch_embed_p']['b']])

    out_c, out_i = fused_encoder(z_c, x_c, z_i, x_i, params)   # (B, L_PAD, D)

    z_c_out = out_c[:, 1:1 + NZ]
    x_c_out = out_c[:, 1 + NZ:1 + NZ + NX]
    z_i_out = out_i[:, 1:1 + NZ]
    x_i_out = out_i[:, 1 + NZ:1 + NZ + NX]
    return z_c_out, x_c_out, z_i_out, x_i_out


# ----------------------------- parameter init -------------------------------
def init_params(key):
    keys = iter(jax.random.split(key, 128))

    def nrm(shape, std=0.02):
        return (std * jax.random.normal(next(keys), shape)).astype(jnp.float32)

    def conv_params():
        # torch Conv2d weight layout: (out_ch, in_ch, kh, kw)
        return {'w': nrm((EMBED, IN_CH, PATCH, PATCH)), 'b': nrm((EMBED,))}

    blocks = []
    for _ in range(DEPTH):
        blocks.append({
            'ln1_g': jnp.ones((EMBED,), jnp.float32),
            'ln1_b': jnp.zeros((EMBED,), jnp.float32),
            'wqkv': nrm((EMBED, 3 * EMBED)), 'bqkv': nrm((3 * EMBED,)),
            'wproj': nrm((EMBED, EMBED)), 'bproj': nrm((EMBED,)),
            'ln2_g': jnp.ones((EMBED,), jnp.float32),
            'ln2_b': jnp.zeros((EMBED,), jnp.float32),
            'w1': nrm((EMBED, MLP_HIDDEN)), 'b1': nrm((MLP_HIDDEN,)),
            'w2': nrm((MLP_HIDDEN, EMBED)), 'b2': nrm((EMBED,)),
        })

    return {
        'patch_embed': conv_params(), 'patch_embed_p': conv_params(),
        'z_patch_embed': conv_params(), 'z_patch_embed_p': conv_params(),
        'pos_embed': nrm((1, 1 + NX, EMBED)), 'pos_embed_p': nrm((1, 1 + NX, EMBED)),
        'z_pos_embed': nrm((1, NZ, EMBED)), 'z_pos_embed_p': nrm((1, NZ, EMBED)),
        'cls_token': nrm((1, 1, EMBED)), 'cls_token_p': nrm((1, 1, EMBED)),
        'blocks': blocks,
        'norm_g': jnp.ones((EMBED,), jnp.float32),
        'norm_b': jnp.zeros((EMBED,), jnp.float32),
        'norm_p_g': jnp.ones((EMBED,), jnp.float32),
        'norm_p_b': jnp.zeros((EMBED,), jnp.float32),
    }


# ----------------------------- pure-JAX reference ---------------------------
# Mirrors the kernel's precision policy (bf16 matmul operands, f32
# accumulation, f32 VPU math) so the correctness check stays tight.
def _mm(a, b):
    return jnp.dot(a.astype(MATMUL_DTYPE), b.astype(MATMUL_DTYPE),
                   preferred_element_type=jnp.float32)


def _ref_patch_embed(x, w, b):
    B, C, H, W = x.shape
    hp, wp = H // PATCH, W // PATCH
    p = x.reshape(B, C, hp, PATCH, wp, PATCH).transpose(0, 2, 4, 1, 3, 5)
    p = p.reshape(B, hp * wp, C * PATCH * PATCH)
    return _mm(p, w.reshape(EMBED, -1).T) + b


def _ref_block(x, p):
    B, L, _ = x.shape
    h = _layernorm_rows(x, p['ln1_g'], p['ln1_b'])
    qkv = _mm(h, p['wqkv']) + p['bqkv']
    q = qkv[..., 0:EMBED].reshape(B, L, HEADS, HEAD_DIM)
    k = qkv[..., EMBED:2 * EMBED].reshape(B, L, HEADS, HEAD_DIM)
    v = qkv[..., 2 * EMBED:3 * EMBED].reshape(B, L, HEADS, HEAD_DIM)
    scale = jnp.float32(1.0 / math.sqrt(HEAD_DIM))
    s = jnp.einsum('blhd,bmhd->bhlm', q.astype(MATMUL_DTYPE),
                   k.astype(MATMUL_DTYPE),
                   preferred_element_type=jnp.float32) * scale
    s = s - jnp.max(s, axis=-1, keepdims=True)
    pr = jnp.exp(s)
    pr = pr / jnp.sum(pr, axis=-1, keepdims=True)
    o = jnp.einsum('bhlm,bmhd->blhd', pr.astype(MATMUL_DTYPE),
                   v.astype(MATMUL_DTYPE),
                   preferred_element_type=jnp.float32).reshape(B, L, EMBED)
    x = x + (_mm(o, p['wproj']) + p['bproj'])
    h2 = _layernorm_rows(x, p['ln2_g'], p['ln2_b'])
    h2 = _mm(h2, p['w1']) + p['b1']
    h2 = _gelu_exact(h2)
    x = x + (_mm(h2, p['w2']) + p['b2'])
    return x


def reference_forward(params, z_color, z_ir, x1_color, x1_ir):
    z_c = _ref_patch_embed(z_color, params['z_patch_embed']['w'], params['z_patch_embed']['b'])
    z_i = _ref_patch_embed(z_ir, params['z_patch_embed_p']['w'], params['z_patch_embed_p']['b'])
    x_c = _ref_patch_embed(x1_color, params['patch_embed']['w'], params['patch_embed']['b'])
    x_i = _ref_patch_embed(x1_ir, params['patch_embed_p']['w'], params['patch_embed_p']['b'])

    x_c = x_c + params['pos_embed'][:, 1:, :]
    z_c = z_c + params['z_pos_embed']
    x_i = x_i + params['pos_embed_p'][:, 1:, :]
    z_i = z_i + params['z_pos_embed_p']

    len_z, len_x, B = z_c.shape[1], x_c.shape[1], x_c.shape[0]

    cls_c = jnp.broadcast_to(params['cls_token'] + params['pos_embed'][:, :1, :], (B, 1, EMBED))
    seq_c = jnp.concatenate([cls_c, z_c, x_c], axis=1)
    for blk in params['blocks']:
        seq_c = _ref_block(seq_c, blk)
    seq_c = _layernorm_rows(seq_c, params['norm_g'], params['norm_b'])

    cls_i = jnp.broadcast_to(params['cls_token_p'] + params['pos_embed_p'][:, :1, :], (B, 1, EMBED))
    seq_i = jnp.concatenate([cls_i, z_i, x_i], axis=1)
    for blk in params['blocks']:
        seq_i = _ref_block(seq_i, blk)
    seq_i = _layernorm_rows(seq_i, params['norm_p_g'], params['norm_p_b'])

    return (seq_c[:, 1:1 + len_z], seq_c[:, 1 + len_z:1 + len_z + len_x],
            seq_i[:, 1:1 + len_z], seq_i[:, 1 + len_z:1 + len_z + len_x])


# ----------------------------- main ------------------------------------------
if __name__ == "__main__":
    key = jax.random.PRNGKey(0)
    kp, kz1, kz2, kx1, kx2 = jax.random.split(key, 5)
    params = init_params(kp)

    B = 2
    z_color = jax.random.normal(kz1, (B, IN_CH, Z_IMG, Z_IMG), jnp.float32)
    z_ir = jax.random.normal(kz2, (B, IN_CH, Z_IMG, Z_IMG), jnp.float32)
    x1_color = jax.random.normal(kx1, (B, IN_CH, X_IMG, X_IMG), jnp.float32)
    x1_ir = jax.random.normal(kx2, (B, IN_CH, X_IMG, X_IMG), jnp.float32)

    outs = mae_encode_forward(params, z_color, z_ir, x1_color, x1_ir)
    outs = jax.block_until_ready(outs)

    refs = reference_forward(params, z_color, z_ir, x1_color, x1_ir)
    refs = jax.block_until_ready(refs)

    names = ("z_color", "x1_color", "z_ir", "x1_ir")
    for name, o, r in zip(names, outs, refs):
        assert o.shape == r.shape, (name, o.shape, r.shape)
        err = float(jnp.max(jnp.abs(o - r)))
        assert err < 2e-3, (name, err)

    print("KERNEL_OK")
</pallas_src>

<mosaic_0001>
module attributes {stable_mosaic.version = 11 : i64} {
  func.func @_patch_embed_kernel(%arg0: i32, %arg1: memref<1x32x256xbf16, #tpu.memory_space<vmem>>, %arg2: memref<1x256x128xbf16, #tpu.memory_space<vmem>>, %arg3: memref<1x1x128xf32, #tpu.memory_space<vmem>>, %arg4: memref<1x32x128xf32, #tpu.memory_space<vmem>>) attributes {dimension_semantics = [#tpu.dimension_semantics<parallel>], iteration_bounds = array<i64: 4>, scalar_prefetch = 0 : i64, scratch_operands = 0 : i64, tpu.core_type = #tpu.core_type<tc>, window_params = [{transform_indices = @transform_0, window_bounds = array<i64: 1, 32, 256>}, {transform_indices = @transform_1, window_bounds = array<i64: 1, 256, 128>}, {transform_indices = @transform_2, window_bounds = array<i64: 1, 1, 128>}, {transform_indices = @transform_3, window_bounds = array<i64: 1, 32, 128>}]} {
    %c0 = arith.constant 0 : index
    %c0_0 = arith.constant 0 : index
    %c0_1 = arith.constant 0 : index
    %0 = vector.load %arg1[%c0, %c0_0, %c0_1] : memref<1x32x256xbf16, #tpu.memory_space<vmem>>, vector<1x32x256xbf16>
    %1 = vector.shape_cast %0 : vector<1x32x256xbf16> to vector<32x256xbf16>
    %c0_2 = arith.constant 0 : index
    %c0_3 = arith.constant 0 : index
    %c0_4 = arith.constant 0 : index
    %2 = vector.load %arg2[%c0_2, %c0_3, %c0_4] : memref<1x256x128xbf16, #tpu.memory_space<vmem>>, vector<1x256x128xbf16>
    %3 = vector.shape_cast %2 : vector<1x256x128xbf16> to vector<256x128xbf16>
    %cst = arith.constant dense<0.000000e+00> : vector<32x128xf32>
    %4 = tpu.matmul %1, %3, %cst {dimension_numbers = #tpu.dot_dimension_numbers<[1], [0], [0], [1], [0, 0, 1, 1], [], []>} : vector<32x256xbf16>, vector<256x128xbf16>, vector<32x128xf32> -> vector<32x128xf32>
    %c0_5 = arith.constant 0 : index
    %c0_6 = arith.constant 0 : index
    %c0_7 = arith.constant 0 : index
    %5 = vector.load %arg3[%c0_5, %c0_6, %c0_7] : memref<1x1x128xf32, #tpu.memory_space<vmem>>, vector<1x1x128xf32>
    %6 = vector.shape_cast %5 : vector<1x1x128xf32> to vector<1x128xf32>
    %7 = vector.broadcast %6 : vector<1x128xf32> to vector<32x128xf32>
    %8 = arith.addf %4, %7 : vector<32x128xf32>
    %c0_8 = arith.constant 0 : index
    %c0_9 = arith.constant 0 : index
    %c0_10 = arith.constant 0 : index
    %9 = vector.load %arg4[%c0_8, %c0_9, %c0_10] : memref<1x32x128xf32, #tpu.memory_space<vmem>>, vector<1x32x128xf32>
    %10 = vector.shape_cast %9 : vector<1x32x128xf32> to vector<32x128xf32>
    %11 = vector.shape_cast %8 : vector<32x128xf32> to vector<1x32x128xf32>
    tpu.vector_store %arg4[%c0_8, %c0_9, %c0_10], %11 {strides = array<i32>} : memref<1x32x128xf32, #tpu.memory_space<vmem>>, vector<1x32x128xf32>,
    return
  }
  func.func @transform_0(%arg0: i32) -> (i32, i32, i32) {
    %c0_i32 = arith.constant 0 : i32
    %c0_i32_0 = arith.constant 0 : i32
    %c0_i32_1 = arith.constant 0 : i32
    return %arg0, %c0_i32, %c0_i32_0 : i32, i32, i32
  }
  func.func @transform_1(%arg0: i32) -> (i32, i32, i32) {
    %c0_i32 = arith.constant 0 : i32
    %c0_i32_0 = arith.constant 0 : i32
    %c0_i32_1 = arith.constant 0 : i32
    return %arg0, %c0_i32, %c0_i32_0 : i32, i32, i32
  }
  func.func @transform_2(%arg0: i32) -> (i32, i32, i32) {
    %c0_i32 = arith.constant 0 : i32
    %c0_i32_0 = arith.constant 0 : i32
    %c0_i32_1 = arith.constant 0 : i32
    return %arg0, %c0_i32, %c0_i32_0 : i32, i32, i32
  }
  func.func @transform_3(%arg0: i32) -> (i32, i32, i32) {
    %c0_i32 = arith.constant 0 : i32
    %c0_i32_0 = arith.constant 0 : i32
    %c0_i32_1 = arith.constant 0 : i32
    return %arg0, %c0_i32, %c0_i32_0 : i32, i32, i32
  }
}

</mosaic_0001>

<bundles_post_ra>
// kernel: tpu_custom_call.1
= control target key start
LH: loop header
LB: loop body
LE: loop exit
PB: predicated region body
PF: predicated region fallthrough
CT: control target
= control target key end

     0   :  { %s1206_s0 = inlined_call_operand.hbm [shape: bf16[4,32,256], index: 0, kind: input, shape index: {}]   ;;  %s1207_s1 = inlined_call_operand.hbm [shape: bf16[4,256,128], index: 1, kind: input, shape index: {}]   ;;  %s1208_s2 = inlined_call_operand.hbm [shape: f32[4,1,128], index: 2, kind: input, shape index: {}]   ;;  %s1209_s3 = inlined_call_operand.hbm [shape: f32[4,32,128], index: 3, kind: output, shape index: {}]  }
   0x1   :  { %1215 = sst [smem:[#allocation15_spill]] %s1206_s0 }
   0x2   :  { %1216 = sst [smem:[#allocation16_spill]] %s1207_s1 }
   0x3   :  { %8 = vsyncpa [#allocation3], 0 }
   0x4   :  { %10 = vsyncpa [#allocation3 + $0x1], 0 }
   0x5   :  { %11 = vsyncpa [#allocation6], 0 }
   0x6   :  { %13 = vsyncpa [#allocation6 + $0x1], 0 }
   0x7   :  { %14 = vsyncpa [#allocation4], 0 }
   0x8   :  { %16 = vsyncpa [#allocation4 + $0x1], 0  ;;  %s955_s12 = smov 0   ;;  %s957_s13 = smov 0  }
   0x9   :  { %s959_s14 = smov 0   ;;  %s961_s15 = smov 0  }
   0xa LB: > { %1217 = sst [smem:[#allocation12_spill]] %s919_s14  ;;  %s976_s16 = sadd.s32 4294967295, %s923_s15   ;;  %s923_s15 = sphi %s961_s15, %s1233_s15   ;;  %s919_s14 = sphi %s959_s14, %s1235_s14   ;;  %s915_s13 = sphi %s957_s13, %s1237_s13   ;;  %s911_s12 = sphi %s955_s12, %s1236_s12  }
   0xb   : > { %s600_s17 = sadd.s32 4294967294, %s923_s15   ;;  %s980_s18 = sadd.s32 1, %s923_s15  }
   0xc   : > { %1218 = sst [smem:[#allocation13_spill]] %s980_s18  ;;  %s29_s19 = sadd.s32 1, %s919_s14 }
   0xd   : > { %s26_s20 = ssub.s32 %s923_s15, %s980_s18  ;;  %p36_p0 = scmp.ne.s32.totalorder %s919_s14, %s915_s13 }
   0xe   : > { %p27_p1 = scmp.eq.s32.totalorder %s26_s20, 0  ;;  %p37_p2 = scmp.eq.s32.totalorder %s923_s15, 0 }
   0xf   : > { %p42_p3 = scmp.ne.s32.totalorder %s915_s13, %s911_s12  ;;  %p43_p4 = scmp.eq.s32.totalorder %s976_s16, 0 }
  0x10   : > { %s992_s21 = scalar_select %p27_p1, %s919_s14, %s29_s19  }
  0x11   : > { %p38_p5 = por %p37_p2, %p36_p0  ;;  %p994_p6 = por %p43_p4, %p42_p3 }
  0x12   : > { %1219 = sst [smem:[#allocation14_spill]] %s992_s21  ;;  %p118_p7 = scmp.eq.s32.totalorder %s976_s16, 3 }
  0x13   : > { %s1220_s22 = scalar_select %p994_p6, 1, 0 }
  0x14   : > { %p124_p8 = scmp.eq.s32.totalorder %s600_s17, 3  ;;  %p709_p9 = scmp.lt.s32.totalorder %s923_s15, 4 }
  0x15   : > { %p1000_p10 = por %p118_p7, %p36_p0  ;;  %s1009_s25 = sand.u32 1, %s919_s14  }
  0x16   : > { %p1004_p11 = por %p124_p8, %p42_p3  ;;  %p1011_p12 = pnand %p709_p9, %p38_p5 }
  0x17   : > { %s1221_s23 = scalar_select %p1000_p10, 1, 0 }
  0x18   : > { %s1222_s24 = scalar_select %p1004_p11, 1, 0 }
  0x19   : > { %s165_s27 = sand.u32 1, %s923_s15   ;;  %s606_s28 = sshll.u32 %s1009_s25, 7 }
  0x1a   : > { %s641_s29 = sshll.u32 %s923_s15, 11  ;;  %s1224_s1 = sld [smem:[#allocation16_spill]] }
  0x1b   : > { %s169_s6 = scalar_lea.vmem [#allocation5], %s606_s28  ;;  %s1026_s8 = scalar_lea.sflag [#allocation6], %s165_s27 }
  0x1c   : > { %s176_s7 = sshll.u32 %s169_s6, 4  ;;  %p1032_p1 = pneg %p1011_p12  ;;  %s1023_s7 = int_to_ptr.vmem [resolvable:$true] %s176_s7 }
  0x20   : > { %s1021_s5 = scalar_lea.hbm %s1224_s1, %s641_s29  ;;  %s776_s19 = scalar_lea.hbm %s1224_s1, 8192 }
  0x21   : > { %s771_s9 = scalar_lea.hbm %s1021_s5, 2048  ;;  %p777_p4 = scmp.lt.s32.totalorder %s1021_s5, %s1224_s1 }
  0x22   : > { %p772_p0 = scmp.ne.s32.totalorder %s1021_s5, %s771_s9  ;;  %p778_p5 = scmp.lt.s32.totalorder %s776_s19, %s771_s9 }
  0x24   : > { %p774_p2 = pnand %p1032_p1, %p772_p0  ;;  %p779_p7 = por %p778_p5, %p777_p4 }
  0x26   : > { %p775_p3 = pneg %p774_p2 }
  0x28   : > { %p780_p8 = pnand %p779_p7, %p775_p3 }
  0x2a   : > { %783 = shalt.err (!%p780_p8)
}
  0x2b   : > { %s784_s27 = scalar_lea.vmem %s1023_s7, 2048  ;;  %s925_s29 = smov [#allocation5]  }
  0x2c   : > { %p785_p9 = scmp.ne.s32.totalorder %s1023_s7, %s784_s27  ;;  %s789_s30 = sshll.u32 %s925_s29, 4  ;;  %s790_s30 = int_to_ptr.vmem [resolvable:$false] %s789_s30 }
  0x2d   : > { %s791_s4 = scalar_lea.vmem %s790_s30, 4096  ;;  %p792_p13 = scmp.lt.s32.totalorder %s1023_s7, %s790_s30 }
  0x2e   : > { %p787_p0 = pnand %p785_p9, %p1032_p1  ;;  %p793_p11 = scmp.lt.s32.totalorder %s791_s4, %s784_s27 }
  0x30   : > { %p788_p2 = pneg %p787_p0  ;;  %p794_p10 = por %p793_p11, %p792_p13 }
  0x32   : > { %p795_p6 = pnand %p794_p10, %p788_p2 }
  0x34   : > { %798 = shalt.err (!%p795_p6)
}
  0x35   : > { %s926_s6 = smov 64   ;;  %s927_s9 = smov 4  }
  0x36   : > { %701 = dma.hbm_to_vmem [thread:$0]  (!%p1011_p12), %s1021_s5, 2048, %s1023_s7, %s1026_s8, %s926_s6, %s926_s6, %s927_s9  }
  0x37   : > { %p201_p3 = scmp.lt.s32.totalorder %s923_s15, 5  ;;  %s603_s11 = sshll.u32 %s1009_s25, 5 }
  0x38   : > { %s640_s17 = sshll.u32 %s923_s15, 9  ;;  %p1226_p11 = scmp.ge.s32.totalorder %s923_s15, 1 }
  0x39   : > { %s1228_s0 = sld [smem:[#allocation15_spill]]  ;;  %s148_s29 = scalar_lea.vmem [#allocation2], %s603_s11 }
  0x3a   : > { %p1060_p10 = pnand %p1226_p11, %p201_p3  ;;  %s155_s30 = sshll.u32 %s148_s29, 4  ;;  %s1069_s30 = int_to_ptr.vmem [resolvable:$true] %s155_s30 }
  0x3b   : > { %s145_s5 = scalar_lea.sflag [#allocation3], %s1009_s25 }
  0x3c   : > { %s1227_s19 = scalar_select %p1060_p10, 1, 0 }
  0x3f   : > { %s1067_s27 = scalar_lea.hbm %s1228_s0, %s640_s17  ;;  %s804_s9 = scalar_lea.hbm %s1228_s0, 2048 }
  0x40   : > { %s799_s7 = scalar_lea.hbm %s1067_s27, 512  ;;  %p805_p5 = scmp.lt.s32.totalorder %s1067_s27, %s1228_s0 }
  0x41   : > { %p800_p6 = scmp.ne.s32.totalorder %s1067_s27, %s799_s7  ;;  %p806_p7 = scmp.lt.s32.totalorder %s804_s9, %s799_s7 }
  0x43   : > { %p802_p13 = pnand %p800_p6, %p1032_p1  ;;  %p807_p8 = por %p806_p7, %p805_p5 }
  0x45   : > { %p803_p4 = pneg %p802_p13 }
  0x47   : > { %p808_p9 = pnand %p807_p8, %p803_p4 }
  0x49   : > { %811 = shalt.err (!%p808_p9)
}
  0x4a   : > { %s812_s11 = scalar_lea.vmem %s1069_s30, 512  ;;  %s928_s28 = smov [#allocation2]  }
  0x4b   : > { %p813_p0 = scmp.ne.s32.totalorder %s1069_s30, %s812_s11  ;;  %s817_s29 = sshll.u32 %s928_s28, 4  ;;  %s818_s29 = int_to_ptr.vmem [resolvable:$false] %s817_s29 }
  0x4c   : > { %s819_s4 = scalar_lea.vmem %s818_s29, 1024  ;;  %p820_p11 = scmp.lt.s32.totalorder %s1069_s30, %s818_s29 }
  0x4d   : > { %p815_p2 = pnand %p813_p0, %p1032_p1  ;;  %p821_p6 = scmp.lt.s32.totalorder %s819_s4, %s812_s11 }
  0x4f   : > { %p816_p3 = pneg %p815_p2  ;;  %p822_p13 = por %p821_p6, %p820_p11 }
  0x51   : > { %p823_p10 = pnand %p822_p13, %p816_p3 }
  0x53   : > { %826 = shalt.err (!%p823_p10)
}
  0x54   : > { %s929_s7 = smov 128   ;;  %s930_s6 = smov 8  }
  0x55   : > { %698 = dma.hbm_to_vmem [thread:$0]  (!%p1011_p12), %s1067_s27, 512, %s1069_s30, %s145_s5, %s929_s7, %s929_s7, %s930_s6  }
  0x56   : > { %s609_s9 = sshll.u32 %s923_s15, 4  ;;  %s189_s20 = scalar_lea.vmem [#allocation7], %s1009_s25 }
  0x57   : > { %s196_s17 = sshll.u32 %s189_s20, 4  ;;  %s194_s29 = scalar_lea.hbm %s1208_s2, %s609_s9  ;;  %s197_s17 = int_to_ptr.vmem [resolvable:$true] %s196_s17 }
  0x58   : > { %s827_s4 = scalar_lea.hbm %s194_s29, 16  ;;  %s832_s21 = scalar_lea.hbm %s1208_s2, 64 }
  0x59   : > { %p828_p10 = scmp.ne.s32.totalorder %s194_s29, %s827_s4  ;;  %p833_p7 = scmp.lt.s32.totalorder %s194_s29, %s1208_s2 }
  0x5a   : > { %p834_p8 = scmp.lt.s32.totalorder %s832_s21, %s827_s4 }
  0x5b   : > { %p830_p4 = pnand %p828_p10, %p1032_p1 }
  0x5c   : > { %p835_p9 = por %p834_p8, %p833_p7 }
  0x5d   : > { %p831_p5 = pneg %p830_p4 }
  0x5f   : > { %p836_p0 = pnand %p835_p9, %p831_p5 }
  0x61   : > { %839 = shalt.err (!%p836_p0)
}
  0x62   : > { %s840_s25 = scalar_lea.vmem %s197_s17, 16  ;;  %s931_s27 = smov [#allocation7]  }
  0x63   : > { %p841_p2 = scmp.ne.s32.totalorder %s197_s17, %s840_s25  ;;  %s845_s30 = sshll.u32 %s931_s27, 4  ;;  %s846_s30 = int_to_ptr.vmem [resolvable:$false] %s845_s30 }
  0x64   : > { %s847_s5 = scalar_lea.vmem %s846_s30, 32  ;;  %p848_p6 = scmp.lt.s32.totalorder %s197_s17, %s846_s30 }
  0x65   : > { %p843_p3 = pnand %p841_p2, %p1032_p1  ;;  %p849_p13 = scmp.lt.s32.totalorder %s847_s5, %s840_s25 }
  0x67   : > { %p844_p11 = pneg %p843_p3  ;;  %p850_p10 = por %p849_p13, %p848_p6 }
  0x69   : > { %p851_p4 = pnand %p850_p10, %p844_p11 }
  0x6b   : > { %854 = shalt.err (!%p851_p4)
}
  0x6c   : > { %704 = dma.hbm_to_vmem [thread:$0]  (!%p1011_p12), %s194_s29, 16, %s197_s17, %s1026_s8  }
  0x6d   : > { %p1229_p5 = scmp.ne.s32.totalorder %s1227_s19, 0 }
  0x6e   : > { %s1115_s0 = sand.u32 (!%p1229_p5), 1, %s915_s13   ;;  %p1230_p1 = scmp.ne.s32.totalorder (!%p1229_p5), %s1220_s22, 0 }
  0x6f   : > { %205 = sbr.rel (%p1229_p5) target bundleno = 370 (0x172), region = 32  ;;  %s611_s1 = sshll.u32 (!%p1229_p5), %s1115_s0, 5 }
  0x70   : > { %s208_s14 = scalar_lea.sflag (!%p1229_p5), [#allocation3], %s1115_s0  ;;  %s1121_s18 = scalar_lea.vmem (!%p1229_p5), [#allocation2], %s611_s1 }
  0x74   : > { %898 = dma.done.wait (%p1230_p1), %s208_s14, 512  }
  0x75   : > { %900 = vsyncadd (%p1230_p1), %s208_s14, 4294966784  ;;  %s216_s21 = sand.u32 1, %s976_s16   ;;  %s612_s26 = sshll.u32 %s1115_s0, 7 }
  0x76   : > { %s217_s8 = scalar_lea.sflag [#allocation6], %s216_s21  ;;  %s1129_s10 = scalar_lea.vmem [#allocation5], %s612_s26 }
  0x77   : > { %902 = dma.done.wait (%p1230_p1), %s217_s8, 2064  }
  0x78   : > { %904 = vsyncadd (%p1230_p1), %s217_s8, 4294965232  ;;  %v749_v0 = vld [vmem:[%s1129_s10 + $0x78] sm:$0xff]   ;;  %v751_v2 = vld [vmem:[%s1129_s10 + $0x70] sm:$0xff]   ;;  %s228_s22 = scalar_lea.vmem [#allocation7], %s1115_s0  ;;  %s259_s19 = scalar_lea.vmem [#allocation8], %s611_s1 }
  0x79   : > { %v750_v1 = vld [vmem:[%s1129_s10 + $0x38] sm:$0xff]   ;;  %643 = vmatprep.subr.bf16.mxu0 %v749_v0  ;;  %671 = vmatprep.subr.bf16.mxu1 %v749_v0  ;;  %v752_v3 = vld [vmem:[%s1129_s10 + $0x30] sm:$0xff]   ;;  %v753_v4 = vld [vmem:[%s1129_s10 + $0x68] sm:$0xff]   ;;  %s487_s7 = sshll.u32 %s259_s19, 4  ;;  %s642_s6 = sshll.u32 %s976_s16, 9  ;;  %s1159_s7 = int_to_ptr.vmem [resolvable:$true] %s487_s7 }
  0x7a   : > { %644 = vmatpush3.bf16.msra.mxu0 %v750_v1  ;;  %679 = vmatpush3.bf16.msra.mxu1 %v750_v1  ;;  %v754_v5 = vld [vmem:[%s1129_s10 + $0x28] sm:$0xff]   ;;  %v755_v6 = vld [vmem:[%s1129_s10 + $0x60] sm:$0xff]   ;;  %v757_v8 = vld [vmem:[%s1129_s10 + $0x58] sm:$0xff]   ;;  %s1164_s17 = scalar_lea.hbm %s1209_s3, %s642_s6  ;;  %s474_s16 = scalar_lea.sflag [#allocation4], %s1115_s0 }
  0x7b   : > { %645 = vmatprep.subr.bf16.mxu0 %v751_v2  ;;  %672 = vmatprep.subr.bf16.mxu1 %v751_v2  ;;  %v756_v7 = vld [vmem:[%s1129_s10 + $0x20] sm:$0xff]   ;;  %v758_v9 = vld [vmem:[%s1129_s10 + $0x18] sm:$0xff]   ;;  %v759_v10 = vld [vmem:[%s1129_s10 + $0x50] sm:$0xff]   ;;  %s855_s28 = scalar_lea.vmem %s1159_s7, 512  ;;  %p1231_p7 = scmp.ne.s32.totalorder %s1221_s23, 0 }
  0x7c   : > { %v767_v11 = vld [vmem:[%s1121_s18 + $0x4] ss:$8 sps:$4 sm:$0xff]   ;;  %v770_v12 = vld [vmem:[%s1121_s18 + $0x14] ss:$8 sps:$4 sm:$0xff]   ;;  %v765_v18 = vld [vmem:[%s1121_s18] ss:$8 sps:$4 sm:$0xff]   ;;  %p856_p12 = scmp.ne.s32.totalorder %s1159_s7, %s855_s28 }
  0x7d   : > { %v760_v13 = vld [vmem:[%s1129_s10 + $0x10] sm:$0xff]   ;;  %v761_v14 = vld [vmem:[%s1129_s10 + $0x48] sm:$0xff]   ;;  %452 = vmatprep.mubr.bf16.mxu0 %v767_v11  ;;  %460 = vmatprep.mubr.bf16.mxu1 %v770_v12  ;;  %v763_v16 = vld [vmem:[%s1129_s10 + $0x40] sm:$0xff]   ;;  %s932_s11 = smov [#allocation8]  }
  0x7e   : > { %646 = vmatpush3.bf16.msra.mxu0 %v752_v3  ;;  %680 = vmatpush3.bf16.msra.mxu1 %v752_v3  ;;  %v762_v15 = vld [vmem:[%s1129_s10 + $0x8] sm:$0xff]   ;;  %v764_v17 = vld [vmem:[%s1129_s10] sm:$0xff]   ;;  %v768_v19 = vld [vmem:[%s1121_s18 + $0x10] ss:$8 sps:$4 sm:$0xff]   ;;  %p857_p8 = pnand %p856_p12, %p1231_p7  ;;  %s859_s29 = sshll.u32 %s932_s11, 4  ;;  %s860_s29 = int_to_ptr.vmem [resolvable:$false] %s859_s29 }
  0x7f   : > { %647 = vmatprep.subr.bf16.mxu0 %v753_v4  ;;  %673 = vmatprep.subr.bf16.mxu1 %v753_v4  ;;  %v614_v22 = vld [vmem:[%s228_s22] ss:$0 sm:$0xff]  ;;  %s861_s4 = scalar_lea.vmem %s860_s29, 1024  ;;  %p862_p0 = scmp.lt.s32.totalorder %s1159_s7, %s860_s29 }
  0x80   : > { %p858_p9 = pneg %p857_p8  ;;  %p863_p2 = scmp.lt.s32.totalorder %s861_s4, %s855_s28 }
  0x82   : > { %648 = vmatpush3.bf16.msra.mxu0 %v754_v5  ;;  %681 = vmatpush3.bf16.msra.mxu1 %v754_v5  ;;  %p864_p3 = por %p863_p2, %p862_p0 }
  0x83   : > { %649 = vmatprep.subr.bf16.mxu0 %v755_v6  ;;  %674 = vmatprep.subr.bf16.mxu1 %v755_v6 }
  0x84   : > { %p865_p11 = pnand %p864_p3, %p858_p9 }
  0x86   : > { %650 = vmatpush3.bf16.msra.mxu0 %v756_v7  ;;  %682 = vmatpush3.bf16.msra.mxu1 %v756_v7 }
  0x87   : > { %651 = vmatprep.subr.bf16.mxu0 %v757_v8  ;;  %675 = vmatprep.subr.bf16.mxu1 %v757_v8 }
  0x8a   : > { %652 = vmatpush3.bf16.msra.mxu0 %v758_v9  ;;  %683 = vmatpush3.bf16.msra.mxu1 %v758_v9 }
  0x8b   : > { %653 = vmatprep.subr.bf16.mxu0 %v759_v10  ;;  %676 = vmatprep.subr.bf16.mxu1 %v759_v10 }
  0x8e   : > { %654 = vmatpush3.bf16.msra.mxu0 %v760_v13  ;;  %684 = vmatpush3.bf16.msra.mxu1 %v760_v13 }
  0x8f   : > { %655 = vmatprep.subr.bf16.mxu0 %v761_v14  ;;  %677 = vmatprep.subr.bf16.mxu1 %v761_v14 }
  0x92   : > { %656 = vmatpush3.bf16.msra.mxu0 %v762_v15  ;;  %685 = vmatpush3.bf16.msra.mxu1 %v762_v15 }
  0x93   : > { %657 = vmatprep.subr.bf16.mxu0 %v763_v16  ;;  %678 = vmatprep.subr.bf16.mxu1 %v763_v16 }
  0x96   : > { %658 = vmatpush3.bf16.msra.mxu0 %v764_v17  ;;  %686 = vmatpush3.bf16.msra.mxu1 %v764_v17 }
  0x99   : > { %453 = vmatmul.mubr.bf16.vlgmr.msra.gmra.mxu0 %v765_v18  ;;  %461 = vmatmul.mubr.bf16.vlgmr.msra.gmra.mxu1 %v768_v19 }
 0x159   : > { %v659_v20 = vpop.f32.mrf.mxu0  ;;  %v665_v21 = vpop.f32.mrf.mxu1 }
 0x15b   : > { %v660_v23 = vpop.f32.mrf.mxu0  ;;  %v666_v24 = vpop.f32.mrf.mxu1 }
 0x15c   : > { %v661_v25 = vadd.f32 %v660_v23, %v659_v20  ;;  %v667_v26 = vadd.f32 %v666_v24, %v665_v21 }
 0x15d   : > { %v662_v27 = vpop.f32.mrf.mxu0  ;;  %v668_v28 = vpop.f32.mrf.mxu1 }
 0x15e   : > { %v455_v29 = vadd.f32 %v661_v25, %v614_v22  ;;  %v463_v30 = vadd.f32 %v667_v26, %v614_v22 }
 0x15f   : > { %v663_v31 = vpop.f32.mrf.mxu0  ;;  %v669_v32 = vpop.f32.mrf.mxu1 }
 0x160   : > { %469 = vst [vmem:[%s259_s19] sm:$0xff] %v455_v29  ;;  %471 = vst [vmem:[%s259_s19 + $0x10] sm:$0xff] %v463_v30  ;;  %v664_v33 = vadd.f32 %v663_v31, %v662_v27  ;;  %v670_v34 = vadd.f32 %v669_v32, %v668_v28 }
 0x162   : > { %v458_v35 = vadd.f32 %v664_v33, %v614_v22  ;;  %v466_v36 = vadd.f32 %v670_v34, %v614_v22 }
 0x164   : > { %470 = vst [vmem:[%s259_s19 + $0x8] sm:$0xff] %v458_v35  ;;  %472 = vst [vmem:[%s259_s19 + $0x18] sm:$0xff] %v466_v36 }
 0x165   : > { %868 = shalt.err (!%p865_p11)
}
 0x166   : > { %s869_s25 = scalar_lea.hbm %s1164_s17, 512  ;;  %s873_s5 = scalar_lea.hbm %s1209_s3, 2048 }
 0x167   : > { %p870_p6 = scmp.ne.s32.totalorder %s1164_s17, %s869_s25  ;;  %p874_p4 = scmp.lt.s32.totalorder %s1164_s17, %s1209_s3 }
 0x168   : > { %p875_p5 = scmp.lt.s32.totalorder %s873_s5, %s869_s25 }
 0x169   : > { %p871_p13 = pnand %p870_p6, %p1231_p7 }
 0x16a   : > { %p876_p1 = por %p875_p5, %p874_p4 }
 0x16b   : > { %p872_p10 = pneg %p871_p13 }
 0x16d   : > { %p877_p12 = pnand %p876_p1, %p872_p10 }
 0x16f   : > { %880 = shalt.err (!%p877_p12)
}
 0x170   : > { %s933_s18 = smov 128   ;;  %s934_s21 = smov 8  }
 0x171   : > { %693 = dma.vmem_to_hbm [thread:$0]  (%p1231_p7), %s1159_s7, 512, %s1164_s17, %s474_s16, %s933_s18, %s933_s18, %s934_s21  }
 0x172 PF: > { %p710_p8 = scmp.ge.s32.totalorder %s923_s15, 2  ;;  %s502_s26 = sand.u32 1, %s911_s12  }
 0x173   : > { %p1232_p9 = scmp.ne.s32.totalorder %s1222_s24, 0  ;;  %s503_s8 = scalar_lea.sflag [#allocation4], %s502_s26 }
 0x175   : > { %p706_p0 = pnand %p710_p8, %p1232_p9 }
 0x177   : > { %p707_p2 = pneg %p706_p0 }
 0x179   : > { %906 = dma.done.wait (%p707_p2), %s503_s8, 512  }
 0x17a   : > { %908 = vsyncadd (%p707_p2), %s503_s8, 4294966784  ;;  %s1233_s15 = sld [smem:[#allocation13_spill]]  ;;  %s1236_s12 = smov %s915_s13 }
 0x17b   : > { %s1234_s10 = sld [smem:[#allocation12_spill]] }
 0x17c   : > { %s1235_s14 = sld [smem:[#allocation14_spill]] }
 0x180   : > { %p19_p3 = scmp.ge.s32.totalorder %s1233_s15, 6  }
 0x181   : > { %s1237_s13 = smov %s1234_s10 }
 0x182   :  { %21 = sbr.rel (!%p19_p3) target bundleno = 10 (0xa), region = 101 }
 0x187   :  { %508 = vsyncpa [#allocation3], 1 }
 0x188   :  { %510 = vsyncpa [#allocation3 + $0x1], 1 }
 0x189   :  { %511 = vsyncpa [#allocation6], 1 }
 0x18a   :  { %513 = vsyncpa [#allocation6 + $0x1], 1 }
 0x18b   :  { %514 = vsyncpa [#allocation4], 1 }
 0x18c   :  { %516 = vsyncpa [#allocation4 + $0x1], 1 }

</bundles_post_ra>
